<compile_context>
chip_gen: v6e
topology: v6e:2x2x1
jax: 0.10.0
libtpu: 0.0.40
codegen_flags: <defaults>
</compile_context>

<pallas_src>
import functools

import jax
import jax.numpy as jnp
from jax import lax
from jax.experimental import pallas as pl
from jax.experimental.pallas import tpu as pltpu


def _round_up(x, m):
    return ((x + m - 1) // m) * m


def _vmem_capacity_bytes():
    try:
        return int(pltpu.get_tpu_info().vmem_capacity_bytes)
    except Exception:
        return 64 * 1024 * 1024  # conservative default (v7x physical VMEM)


def prepare_vocab_proj(weight, bias, *, tv=1024, dtype=None):
    """One-time weight prep (NOT in the per-call hot path).

    weight: (V, E) torch nn.Linear layout.  Returns (w2t, bias_p, V) where
    w2t is (E, Vp) pre-transposed and pre-padded to a multiple of the vocab
    tile, bias_p is (Vp,), and V is the original vocab size.
    Optionally casts w2t to a low-precision dtype (e.g. jnp.bfloat16).
    """
    V, E = weight.shape
    tv = max(128, min(tv, _round_up(V, 128)))
    Vp = _round_up(V, tv)
    w2t = jnp.asarray(weight).T
    if dtype is not None:
        w2t = w2t.astype(dtype)
    b2 = jnp.asarray(bias)
    if Vp != V:
        w2t = jnp.pad(w2t, ((0, 0), (0, Vp - V)))
        b2 = jnp.pad(b2, (0, Vp - V))
    return w2t, b2, V


def _lm_head_kernel(x_ref, w1_ref, b1_ref, g_ref, beta_ref, w2t_ref, b2_ref,
                    out_ref, h_ref):
    # grid = (vocab_tiles OUTER, row_tiles INNER); sequential ("arbitrary").
    j = pl.program_id(0)          # vocab tile
    i = pl.program_id(1)          # row tile
    tm = out_ref.shape[0]
    row0 = pl.multiple_of(i * tm, tm)

    @pl.when(j == 0)
    def _():
        # dense + gelu + layernorm, computed once per row tile on the FIRST
        # vocab pass and cached in the resident VMEM scratch.
        h = jnp.dot(x_ref[...], w1_ref[...],
                    preferred_element_type=jnp.float32) + b1_ref[...]
        # exact (erf) gelu, matching torch.nn.functional.gelu default
        h = 0.5 * h * (1.0 + lax.erf(h * 0.7071067811865476))
        # one-pass LayerNorm; guard variance against cancellation rounding
        mean = jnp.mean(h, axis=-1, keepdims=True)
        var = jnp.maximum(jnp.mean(h * h, axis=-1, keepdims=True) - mean * mean,
                          0.0)
        h = (h - mean) * lax.rsqrt(var + 1e-5)
        h = h * g_ref[...] + beta_ref[...]
        # scratch dtype follows w2t dtype (bf16 weights -> bf16 MXU input path,
        # f32 accumulation below).
        h_ref[pl.ds(row0, tm), :] = h.astype(h_ref.dtype)

    h_blk = h_ref[pl.ds(row0, tm), :]
    out_ref[...] = (jnp.dot(h_blk, w2t_ref[...],
                            preferred_element_type=jnp.float32)
                    + b2_ref[...]).astype(out_ref.dtype)


def _lm_head_chunk(x, w1, b1_2d, g_2d, beta_2d, w2t, b2_2d, *,
                   tm, tv, out_dtype, vmem_limit):
    rows, E = x.shape
    Vp = w2t.shape[1]
    grid = (Vp // tv, rows // tm)   # vocab OUTER -> w2t tile DMA'd once per j

    isz = lambda a: jnp.dtype(a.dtype).itemsize
    cost = pl.CostEstimate(
        flops=2 * rows * E * E + 2 * rows * E * Vp,
        transcendentals=rows * E,
        bytes_accessed=(rows * E * isz(x) + E * E * isz(w1)
                        + E * Vp * isz(w2t) + Vp * 4
                        + rows * Vp * jnp.dtype(out_dtype).itemsize),
    )

    return pl.pallas_call(
        _lm_head_kernel,
        out_shape=jax.ShapeDtypeStruct((rows, Vp), out_dtype),
        grid_spec=pltpu.PrefetchScalarGridSpec(
            num_scalar_prefetch=0,
            grid=grid,
            in_specs=[
                # features only needed on the first vocab pass; pin the block
                # index afterwards so the row tiles are not re-DMA'd per j.
                pl.BlockSpec((tm, E), lambda j, i: (jnp.where(j == 0, i, 0), 0)),
                pl.BlockSpec((E, E), lambda j, i: (0, 0)),    # dense weight
                pl.BlockSpec((1, E), lambda j, i: (0, 0)),    # dense bias
                pl.BlockSpec((1, E), lambda j, i: (0, 0)),    # LN gamma
                pl.BlockSpec((1, E), lambda j, i: (0, 0)),    # LN beta
                pl.BlockSpec((E, tv), lambda j, i: (0, j)),   # vocab proj tile
                pl.BlockSpec((1, tv), lambda j, i: (0, j)),   # vocab bias tile
            ],
            out_specs=pl.BlockSpec((tm, tv), lambda j, i: (i, j)),
            # h for the whole row-chunk, resident across all vocab tiles.
            scratch_shapes=[pltpu.VMEM((rows, E), w2t.dtype)],
        ),
        compiler_params=pltpu.CompilerParams(
            dimension_semantics=("arbitrary", "arbitrary"),
            vmem_limit_bytes=vmem_limit,
        ),
        cost_estimate=cost,
    )(x, w1, b1_2d, g_2d, beta_2d, w2t, b2_2d)


@functools.partial(jax.jit, static_argnames=("tm", "tv", "out_dim", "out_dtype"))
def roberta_lm_head(features, w1, b1, gamma, beta, w2t, bias, *,
                    tm=256, tv=1024, out_dim=None, out_dtype=None):
    """RobertaLMHead forward.

    features: (N, E)  flattened tokens (masked-token gather done by caller).
    w1:       (E, E)  dense weight stored as (in, out) = torch_weight.T.
    b1, gamma, beta: (E,)
    w2t:      (E, Vp) vocab projection, PRE-transposed (and ideally pre-padded
                      via prepare_vocab_proj); may be bf16.
    bias:     (Vp,)
    out_dim:  if given, slice the vocab dimension of the result to this size.
    """
    N, E = features.shape
    Vp = w2t.shape[1]
    out_dtype = features.dtype if out_dtype is None else jnp.dtype(out_dtype)

    # ---- vocab tile (lane-dense, divides the -- ideally pre-padded -- Vp)
    tv = max(128, min(tv, _round_up(Vp, 128)))
    if Vp % tv != 0:
        # Slow path: per-call pad.  Prefer prepare_vocab_proj() (done once).
        new_vp = _round_up(Vp, tv)
        w2t = jnp.pad(w2t, ((0, 0), (0, new_vp - Vp)))
        bias = jnp.pad(bias, (0, new_vp - Vp))
        Vp = new_vp

    # ---- row tile, aligned to the h-scratch sublane packing
    h_isz = jnp.dtype(w2t.dtype).itemsize
    row_align = 8 * max(1, 4 // h_isz)          # f32:8, bf16:16, int8/fp8:32
    tm = max(row_align, min(_round_up(tm, row_align), _round_up(N, row_align)))
    Np = _round_up(N, tm)

    # ---- VMEM budget: keep as many rows of h resident as fit, so w2t streams
    # from HBM exactly once per chunk (ideally once total).  Cap everything
    # against the real per-generation VMEM capacity (64 MiB on v7x).
    cap = _vmem_capacity_bytes()
    budget = int(cap * 0.85)
    isz_x = jnp.dtype(features.dtype).itemsize
    isz_w1 = jnp.dtype(w1.dtype).itemsize
    isz_o = jnp.dtype(out_dtype).itemsize
    fixed = (2 * tm * E * isz_x          # features tile (double-buffered)
             + 2 * E * E * isz_w1        # dense weight
             + 2 * 3 * E * 4             # b1 / gamma / beta
             + 2 * E * tv * h_isz        # vocab weight tile
             + 2 * tv * 4                # vocab bias tile
             + 2 * tm * tv * isz_o       # output tile
             + (2 << 20))                # slack for compiler-internal scratch
    rows_fit = max(tm, ((budget - fixed) // (E * h_isz)) // tm * tm)
    rows_per_call = min(Np, rows_fit)

    vmem_need = fixed + rows_per_call * E * h_isz
    vmem_limit = int(min(cap * 0.9, max(vmem_need * 1.3, 48 * 1024 * 1024)))

    x = features
    if Np != N:
        x = jnp.pad(x, ((0, Np - N), (0, 0)))
    b1_2d = b1.reshape(1, E)
    g_2d = gamma.reshape(1, E)
    beta_2d = beta.reshape(1, E)
    b2_2d = bias.reshape(1, Vp)

    chunks = []
    for r0 in range(0, Np, rows_per_call):
        rows = min(rows_per_call, Np - r0)
        chunks.append(_lm_head_chunk(
            x[r0:r0 + rows], w1, b1_2d, g_2d, beta_2d, w2t, b2_2d,
            tm=tm, tv=tv, out_dtype=out_dtype, vmem_limit=vmem_limit))
    out = chunks[0] if len(chunks) == 1 else jnp.concatenate(chunks, axis=0)

    if Np != N:
        out = out[:N]
    if out_dim is not None and out_dim != Vp:
        out = out[:, :out_dim]
    return out


def _reference(features, w1, b1, gamma, beta, weight, bias):
    h = features @ w1 + b1
    h = 0.5 * h * (1.0 + lax.erf(h * 0.7071067811865476))
    mean = jnp.mean(h, axis=-1, keepdims=True)
    var = jnp.mean((h - mean) ** 2, axis=-1, keepdims=True)
    h = (h - mean) * lax.rsqrt(var + 1e-5) * gamma + beta
    return h @ weight.T + bias


if __name__ == "__main__":
    # Small shapes: batch=2, seq=8, embed_dim=128, output_dim(vocab)=256
    batch, seq, E, V = 2, 8, 128, 256
    N = batch * seq

    key = jax.random.PRNGKey(0)
    k_feat, k_w1, k_b1, k_w2 = jax.random.split(key, 4)

    features = jax.random.normal(k_feat, (batch, seq, E), dtype=jnp.float32)
    # nn.Linear(E, E): weight (E, E), bias (E,). Stored here as (in, out) = W^T.
    w1 = jax.random.normal(k_w1, (E, E), dtype=jnp.float32) * (E ** -0.5)
    b1 = jax.random.normal(k_b1, (E,), dtype=jnp.float32) * 0.01
    # LayerNorm(E): gamma=1, beta=0 (default init)
    gamma = jnp.ones((E,), dtype=jnp.float32)
    beta = jnp.zeros((E,), dtype=jnp.float32)
    # output projection weight (V, E) (nn.Linear convention), bias zeros
    weight = jax.random.normal(k_w2, (V, E), dtype=jnp.float32) * (E ** -0.5)
    bias = jnp.zeros((V,), dtype=jnp.float32)

    # One-time weight prep: pre-transpose + pre-pad OUTSIDE the hot path.
    w2t, bias_p, V_real = prepare_vocab_proj(weight, bias, tv=1024)

    # TODO(synk): masked_tokens gather (features[masked_tokens, :]) is plain-JAX
    # glue before the kernel; not exercised here (masked_tokens=None path).
    x2d = features.reshape(N, E)

    ref = _reference(x2d, w1, b1, gamma, beta, weight, bias)

    # f32 path
    out = roberta_lm_head(x2d, w1, b1, gamma, beta, w2t, bias_p, out_dim=V_real)
    out = jax.block_until_ready(out)
    if out.shape != (N, V):
        raise AssertionError(f"bad output shape {out.shape}")
    if not jnp.allclose(out, ref, atol=1e-4, rtol=1e-4):
        raise AssertionError("Pallas output (f32) does not match reference")

    # bf16 vocab-weight path (halves the dominant HBM stream) -- loose tolerance
    w2t_bf, bias_bf, _ = prepare_vocab_proj(weight, bias, tv=1024,
                                            dtype=jnp.bfloat16)
    out_bf = roberta_lm_head(x2d, w1, b1, gamma, beta, w2t_bf, bias_bf,
                             out_dim=V_real)
    out_bf = jax.block_until_ready(out_bf)
    if not jnp.allclose(out_bf, ref, atol=1e-1, rtol=1e-1):
        raise AssertionError("Pallas output (bf16 weights) too far from reference")

    print("KERNEL_OK")
</pallas_src>

<mosaic_0001>
module attributes {stable_mosaic.version = 11 : i64} {
  func.func @_lm_head_kernel(%arg0: i32, %arg1: i32, %arg2: memref<16x128xf32, #tpu.memory_space<vmem>>, %arg3: memref<128x128xf32, #tpu.memory_space<vmem>>, %arg4: memref<1x128xf32, #tpu.memory_space<vmem>>, %arg5: memref<1x128xf32, #tpu.memory_space<vmem>>, %arg6: memref<1x128xf32, #tpu.memory_space<vmem>>, %arg7: memref<128x256xf32, #tpu.memory_space<vmem>>, %arg8: memref<1x256xf32, #tpu.memory_space<vmem>>, %arg9: memref<16x256xf32, #tpu.memory_space<vmem>>, %arg10: memref<16x128xf32, #tpu.memory_space<vmem>>) attributes {dimension_semantics = [#tpu.dimension_semantics<arbitrary>, #tpu.dimension_semantics<arbitrary>], iteration_bounds = array<i64: 1, 1>, scalar_prefetch = 0 : i64, scratch_operands = 1 : i64, tpu.core_type = #tpu.core_type<tc>, window_params = [{transform_indices = @transform_0, window_bounds = array<i64: 16, 128>}, {pipeline_mode = #tpu.pipeline_mode<synchronous>, transform_indices = @transform_1, window_bounds = array<i64: 128, 128>}, {pipeline_mode = #tpu.pipeline_mode<synchronous>, transform_indices = @transform_2, window_bounds = array<i64: 1, 128>}, {pipeline_mode = #tpu.pipeline_mode<synchronous>, transform_indices = @transform_3, window_bounds = array<i64: 1, 128>}, {pipeline_mode = #tpu.pipeline_mode<synchronous>, transform_indices = @transform_4, window_bounds = array<i64: 1, 128>}, {transform_indices = @transform_5, window_bounds = array<i64: 128, 256>}, {transform_indices = @transform_6, window_bounds = array<i64: 1, 256>}, {transform_indices = @transform_7, window_bounds = array<i64: 16, 256>}]} {
    %c16_i32 = arith.constant 16 : i32
    %0 = arith.muli %arg1, %c16_i32 : i32
    %1 = tpu.assume_multiple %0, 16 : i32
    %c0_i32 = arith.constant 0 : i32
    %2 = arith.cmpi eq, %arg0, %c0_i32 : i32
    %3 = arith.extui %2 : i1 to i32
    %c0_i32_0 = arith.constant 0 : i32
    %4 = arith.cmpi ne, %3, %c0_i32_0 : i32
    scf.if %4 {
      %c0_7 = arith.constant 0 : index
      %c0_8 = arith.constant 0 : index
      %13 = vector.load %arg2[%c0_7, %c0_8] : memref<16x128xf32, #tpu.memory_space<vmem>>, vector<16x128xf32>
      %c0_9 = arith.constant 0 : index
      %c0_10 = arith.constant 0 : index
      %14 = vector.load %arg3[%c0_9, %c0_10] : memref<128x128xf32, #tpu.memory_space<vmem>>, vector<128x128xf32>
      %cst_11 = arith.constant dense<0.000000e+00> : vector<16x128xf32>
      %15 = tpu.matmul %13, %14, %cst_11 {dimension_numbers = #tpu.dot_dimension_numbers<[1], [0], [0], [1], [0, 0, 1, 1], [], []>} : vector<16x128xf32>, vector<128x128xf32>, vector<16x128xf32> -> vector<16x128xf32>
      %c0_12 = arith.constant 0 : index
      %c0_13 = arith.constant 0 : index
      %16 = vector.load %arg4[%c0_12, %c0_13] : memref<1x128xf32, #tpu.memory_space<vmem>>, vector<1x128xf32>
      %17 = vector.broadcast %16 : vector<1x128xf32> to vector<16x128xf32>
      %18 = arith.addf %15, %17 : vector<16x128xf32>
      %cst_14 = arith.constant 5.000000e-01 : f32
      %19 = vector.broadcast %cst_14 : f32 to vector<16x128xf32>
      %20 = arith.mulf %19, %18 : vector<16x128xf32>
      %cst_15 = arith.constant 0.707106769 : f32
      %21 = vector.broadcast %cst_15 : f32 to vector<16x128xf32>
      %22 = arith.mulf %18, %21 : vector<16x128xf32>
      %23 = math.erf %22 : vector<16x128xf32>
      %cst_16 = arith.constant 1.000000e+00 : f32
      %24 = vector.broadcast %cst_16 : f32 to vector<16x128xf32>
      %25 = arith.addf %24, %23 : vector<16x128xf32>
      %26 = arith.mulf %20, %25 : vector<16x128xf32>
      %cst_17 = arith.constant dense<0.000000e+00> : vector<16xf32>
      %27 = vector.multi_reduction <add>, %26, %cst_17 [1] : vector<16x128xf32> to vector<16xf32>
      %28 = vector.shape_cast %27 : vector<16xf32> to vector<16x1xf32>
      %cst_18 = arith.constant 1.280000e+02 : f32
      %29 = vector.broadcast %cst_18 : f32 to vector<16x1xf32>
      %30 = arith.divf %28, %29 : vector<16x1xf32>
      %31 = arith.mulf %26, %26 : vector<16x128xf32>
      %cst_19 = arith.constant dense<0.000000e+00> : vector<16xf32>
      %32 = vector.multi_reduction <add>, %31, %cst_19 [1] : vector<16x128xf32> to vector<16xf32>
      %33 = vector.shape_cast %32 : vector<16xf32> to vector<16x1xf32>
      %cst_20 = arith.constant 1.280000e+02 : f32
      %34 = vector.broadcast %cst_20 : f32 to vector<16x1xf32>
      %35 = arith.divf %33, %34 : vector<16x1xf32>
      %36 = arith.mulf %30, %30 : vector<16x1xf32>
      %37 = arith.subf %35, %36 : vector<16x1xf32>
      %cst_21 = arith.constant 0.000000e+00 : f32
      %38 = vector.broadcast %cst_21 : f32 to vector<16x1xf32>
      %39 = arith.maximumf %37, %38 : vector<16x1xf32>
      %40 = vector.broadcast %30 : vector<16x1xf32> to vector<16x128xf32>
      %41 = arith.subf %26, %40 : vector<16x128xf32>
      %cst_22 = arith.constant 9.99999974E-6 : f32
      %42 = vector.broadcast %cst_22 : f32 to vector<16x1xf32>
      %43 = arith.addf %39, %42 : vector<16x1xf32>
      %44 = math.rsqrt %43 : vector<16x1xf32>
      %45 = vector.broadcast %44 : vector<16x1xf32> to vector<16x128xf32>
      %46 = arith.mulf %41, %45 : vector<16x128xf32>
      %c0_23 = arith.constant 0 : index
      %c0_24 = arith.constant 0 : index
      %47 = vector.load %arg5[%c0_23, %c0_24] : memref<1x128xf32, #tpu.memory_space<vmem>>, vector<1x128xf32>
      %48 = vector.broadcast %47 : vector<1x128xf32> to vector<16x128xf32>
      %49 = arith.mulf %46, %48 : vector<16x128xf32>
      %c0_25 = arith.constant 0 : index
      %c0_26 = arith.constant 0 : index
      %50 = vector.load %arg6[%c0_25, %c0_26] : memref<1x128xf32, #tpu.memory_space<vmem>>, vector<1x128xf32>
      %51 = vector.broadcast %50 : vector<1x128xf32> to vector<16x128xf32>
      %52 = arith.addf %49, %51 : vector<16x128xf32>
      %53 = arith.index_cast %1 : i32 to index
      %c0_27 = arith.constant 0 : index
      %54 = vector.load %arg10[%53, %c0_27] : memref<16x128xf32, #tpu.memory_space<vmem>>, vector<16x128xf32>
      tpu.vector_store %arg10[%53, %c0_27], %52 {strides = array<i32>} : memref<16x128xf32, #tpu.memory_space<vmem>>, vector<16x128xf32>,
    } else {
    }
    %5 = arith.index_cast %1 : i32 to index
    %c0 = arith.constant 0 : index
    %6 = vector.load %arg10[%5, %c0] : memref<16x128xf32, #tpu.memory_space<vmem>>, vector<16x128xf32>
    %c0_1 = arith.constant 0 : index
    %c0_2 = arith.constant 0 : index
    %7 = vector.load %arg7[%c0_1, %c0_2] : memref<128x256xf32, #tpu.memory_space<vmem>>, vector<128x256xf32>
    %cst = arith.constant dense<0.000000e+00> : vector<16x256xf32>
    %8 = tpu.matmul %6, %7, %cst {dimension_numbers = #tpu.dot_dimension_numbers<[1], [0], [0], [1], [0, 0, 1, 1], [], []>} : vector<16x128xf32>, vector<128x256xf32>, vector<16x256xf32> -> vector<16x256xf32>
    %c0_3 = arith.constant 0 : index
    %c0_4 = arith.constant 0 : index
    %9 = vector.load %arg8[%c0_3, %c0_4] : memref<1x256xf32, #tpu.memory_space<vmem>>, vector<1x256xf32>
    %10 = vector.broadcast %9 : vector<1x256xf32> to vector<16x256xf32>
    %11 = arith.addf %8, %10 : vector<16x256xf32>
    %c0_5 = arith.constant 0 : index
    %c0_6 = arith.constant 0 : index
    %12 = vector.load %arg9[%c0_5, %c0_6] : memref<16x256xf32, #tpu.memory_space<vmem>>, vector<16x256xf32>
    tpu.vector_store %arg9[%c0_5, %c0_6], %11 {strides = array<i32>} : memref<16x256xf32, #tpu.memory_space<vmem>>, vector<16x256xf32>,
    return
  }
  func.func @transform_0(%arg0: i32, %arg1: i32) -> (i32, i32) {
    %c0_i32 = arith.constant 0 : i32
    %0 = arith.cmpi eq, %arg0, %c0_i32 : i32
    %c0_i32_0 = arith.constant 0 : i32
    %1 = arith.select %0, %arg1, %c0_i32_0 : i32
    %c0_i32_1 = arith.constant 0 : i32
    %c0_i32_2 = arith.constant 0 : i32
    return %1, %c0_i32_1 : i32, i32
  }
  func.func @transform_1(%arg0: i32, %arg1: i32) -> (i32, i32) {
    %c0_i32 = arith.constant 0 : i32
    %c0_i32_0 = arith.constant 0 : i32
    %c0_i32_1 = arith.constant 0 : i32
    return %c0_i32, %c0_i32_0 : i32, i32
  }
  func.func @transform_2(%arg0: i32, %arg1: i32) -> (i32, i32) {
    %c0_i32 = arith.constant 0 : i32
    %c0_i32_0 = arith.constant 0 : i32
    %c0_i32_1 = arith.constant 0 : i32
    return %c0_i32, %c0_i32_0 : i32, i32
  }
  func.func @transform_3(%arg0: i32, %arg1: i32) -> (i32, i32) {
    %c0_i32 = arith.constant 0 : i32
    %c0_i32_0 = arith.constant 0 : i32
    %c0_i32_1 = arith.constant 0 : i32
    return %c0_i32, %c0_i32_0 : i32, i32
  }
  func.func @transform_4(%arg0: i32, %arg1: i32) -> (i32, i32) {
    %c0_i32 = arith.constant 0 : i32
    %c0_i32_0 = arith.constant 0 : i32
    %c0_i32_1 = arith.constant 0 : i32
    return %c0_i32, %c0_i32_0 : i32, i32
  }
  func.func @transform_5(%arg0: i32, %arg1: i32) -> (i32, i32) {
    %c0_i32 = arith.constant 0 : i32
    %c0_i32_0 = arith.constant 0 : i32
    return %c0_i32, %arg0 : i32, i32
  }
  func.func @transform_6(%arg0: i32, %arg1: i32) -> (i32, i32) {
    %c0_i32 = arith.constant 0 : i32
    %c0_i32_0 = arith.constant 0 : i32
    return %c0_i32, %arg0 : i32, i32
  }
  func.func @transform_7(%arg0: i32, %arg1: i32) -> (i32, i32) {
    %c0_i32 = arith.constant 0 : i32
    return %arg1, %arg0 : i32, i32
  }
}

</mosaic_0001>

<bundles_post_ra>
// kernel: roberta_lm_head.1
= control target key start
LH: loop header
LB: loop body
LE: loop exit
PB: predicated region body
PF: predicated region fallthrough
CT: control target
= control target key end

     0   :  { %12 = vsyncpa [#allocation4], 0  ;;  %s641_s0 = inlined_call_operand.hbm [shape: f32[16,128], index: 0, kind: input, shape index: {}]   ;;  %s642_s1 = inlined_call_operand.hbm [shape: f32[128,128], index: 1, kind: input, shape index: {}]   ;;  %s643_s2 = inlined_call_operand.vmem [shape: f32[1,128], index: 2, kind: input, shape index: {}]   ;;  %s644_s3 = inlined_call_operand.vmem [shape: f32[1,128], index: 3, kind: input, shape index: {}]   ;;  %s645_s4 = inlined_call_operand.vmem [shape: f32[1,128], index: 4, kind: input, shape index: {}]   ;;  %s646_s5 = inlined_call_operand.hbm [shape: f32[128,256], index: 5, kind: input, shape index: {}]   ;;  %s647_s6 = inlined_call_operand.vmem [shape: f32[1,256], index: 6, kind: input, shape index: {}]   ;;  %s648_s7 = inlined_call_operand.hbm [shape: f32[16,256], index: 7, kind: output, shape index: {}]  }
   0x1   :  { %13 = vsyncpa [#allocation7], 0 }
   0x2   :  { %14 = vsyncpa [#allocation5], 0  ;;  %s548_s24 = smov [#allocation6]   ;;  %s549_s26 = smov [#allocation3]  }
   0x3   :  { %s37_s25 = sshll.u32 %s548_s24, 4  ;;  %s25_s27 = sshll.u32 %s549_s26, 4  ;;  %s38_s25 = int_to_ptr.vmem [resolvable:$true] %s37_s25  ;;  %s26_s27 = int_to_ptr.vmem [resolvable:$true] %s25_s27 }
   0x4   :  { %s470_s28 = scalar_lea.vmem %s38_s25, 2048  ;;  %p475_p1 = scmp.lt.s32.totalorder %s38_s25, %s38_s25 }
   0x5   :  { %p471_p0 = scmp.ne.s32.totalorder %s38_s25, %s470_s28  ;;  %p476_p2 = scmp.lt.s32.totalorder %s470_s28, %s470_s28 }
   0x7   :  { %p477_p3 = por %p476_p2, %p475_p1 }
   0x9   :  { %p478_p4 = pnand %p477_p3, %p471_p0 }
   0xb   :  { %481 = shalt.err (!%p478_p4)
}
   0xc   :  { %s550_s29 = smov 128   ;;  %s551_s30 = smov 8  }
   0xd   :  { %43 = dma.hbm_to_vmem [thread:$0]  %s642_s1, 2048, %s38_s25, [#allocation7], %s550_s29, %s550_s29, %s551_s30  }
   0xe   :  { %s490_s10 = scalar_lea.vmem %s26_s27, 256  ;;  %p495_p6 = scmp.lt.s32.totalorder %s26_s27, %s26_s27 }
   0xf   :  { %p491_p5 = scmp.ne.s32.totalorder %s26_s27, %s490_s10  ;;  %p496_p7 = scmp.lt.s32.totalorder %s490_s10, %s490_s10 }
  0x11   :  { %p497_p8 = por %p496_p7, %p495_p6 }
  0x13   :  { %p498_p9 = pnand %p497_p8, %p491_p5 }
  0x15   :  { %501 = shalt.err (!%p498_p9)
}
  0x16   :  { %31 = dma.hbm_to_vmem [thread:$0]  %s641_s0, 256, %s26_s27, [#allocation4], %s550_s29, %s550_s29, %s551_s30  }
  0x17   :  { %s552_s13 = smov [#allocation8]  }
  0x18   :  { %s55_s14 = sshll.u32 %s552_s13, 4  ;;  %s56_s14 = int_to_ptr.vmem [resolvable:$true] %s55_s14 }
  0x19   :  { %s510_s15 = scalar_lea.vmem %s56_s14, 4096  ;;  %p515_p11 = scmp.lt.s32.totalorder %s56_s14, %s56_s14 }
  0x1a   :  { %p511_p10 = scmp.ne.s32.totalorder %s56_s14, %s510_s15  ;;  %p516_p12 = scmp.lt.s32.totalorder %s510_s15, %s510_s15 }
  0x1c   :  { %p517_p13 = por %p516_p12, %p515_p11 }
  0x1e   :  { %p518_p0 = pnand %p517_p13, %p511_p10 }
  0x20   :  { %521 = shalt.err (!%p518_p0)
}
  0x21   :  { %s553_s1 = smov 256   ;;  %s554_s16 = smov 16  }
  0x22   :  { %61 = dma.hbm_to_vmem [thread:$0]  %s646_s5, 4096, %s56_s14, [#allocation7], %s553_s1, %s553_s1, %s554_s16  }
  0x23   :  { %542 = dma.done.wait [#allocation4], 256  }
  0x24   :  { %543 = vsyncadd [#allocation4], 4294967040 }
  0x25   :  { %544 = dma.done.wait [#allocation7], 6144  }
  0x26   :  { %545 = vsyncadd [#allocation7], 4294961152  ;;  %v98_v0 = vld [vmem:[#allocation6 + $0x78] sm:$0xff]  ;;  %v97_v1 = vld [vmem:[#allocation6 + $0x70] sm:$0xff]  ;;  %v555_v52 = vmov 0.0  }
  0x27   :  { %410 = vmatprep.subr.mxu0 %v98_v0  ;;  %v96_v2 = vld [vmem:[#allocation6 + $0x68] sm:$0xff]  ;;  %v95_v3 = vld [vmem:[#allocation6 + $0x60] sm:$0xff]  ;;  %v81_v4 = vld [vmem:[#allocation3] sm:$0xff]  ;;  %352 = vmatprep.mubr.f32.mxu1 %v555_v52 }
  0x28   :  { %411 = vmatpush3.msra.mxu0 %v98_v0  ;;  %v94_v5 = vld [vmem:[#allocation6 + $0x58] sm:$0xff]  ;;  %442 = vmatprep.mubr.f32.mxu0 %v81_v4  ;;  %v93_v6 = vld [vmem:[#allocation6 + $0x50] sm:$0xff]  ;;  %v92_v7 = vld [vmem:[#allocation6 + $0x48] sm:$0xff] }
  0x29   :  { %412 = vmatprep.subr.mxu0 %v97_v1  ;;  %v91_v8 = vld [vmem:[#allocation6 + $0x40] sm:$0xff]  ;;  %v90_v9 = vld [vmem:[#allocation6 + $0x38] sm:$0xff]  ;;  %v89_v10 = vld [vmem:[#allocation6 + $0x30] sm:$0xff] }
  0x2a   :  { %413 = vmatpush3.msra.mxu0 %v97_v1  ;;  %v88_v11 = vld [vmem:[#allocation6 + $0x28] sm:$0xff]  ;;  %v87_v12 = vld [vmem:[#allocation6 + $0x20] sm:$0xff]  ;;  %v86_v13 = vld [vmem:[#allocation6 + $0x18] sm:$0xff] }
  0x2b   :  { %414 = vmatprep.subr.mxu0 %v96_v2  ;;  %v85_v14 = vld [vmem:[#allocation6 + $0x10] sm:$0xff]  ;;  %v84_v15 = vld [vmem:[#allocation6 + $0x8] sm:$0xff]  ;;  %v83_v16 = vld [vmem:[#allocation6] sm:$0xff] }
  0x2c   :  { %415 = vmatpush3.msra.mxu0 %v96_v2  ;;  %v82_v17 = vld [vmem:[#allocation3 + $0x8] sm:$0xff]  ;;  %v389_v18 = vld [vmem:[%s643_s2] ss:$0 sm:$0xff]  ;;  %v273_v37 = vld [vmem:[#allocation8 + $0xe8] sm:$0xff] }
  0x2d   :  { %416 = vmatprep.subr.mxu0 %v95_v3  ;;  %v275_v35 = vld [vmem:[#allocation8 + $0xf8] sm:$0xff]  ;;  %v274_v36 = vld [vmem:[#allocation8 + $0xf0] sm:$0xff]  ;;  %v272_v38 = vld [vmem:[#allocation8 + $0xe0] sm:$0xff] }
  0x2e   :  { %417 = vmatpush3.msra.mxu0 %v95_v3  ;;  %288 = vmatprep.subr.mxu1 %v275_v35  ;;  %v271_v39 = vld [vmem:[#allocation8 + $0xd8] sm:$0xff]  ;;  %v270_v40 = vld [vmem:[#allocation8 + $0xd0] sm:$0xff]  ;;  %v269_v41 = vld [vmem:[#allocation8 + $0xc8] sm:$0xff] }
  0x2f   :  { %418 = vmatprep.subr.mxu0 %v94_v5  ;;  %289 = vmatpush1.msra.mxu1 %v274_v36  ;;  %v268_v42 = vld [vmem:[#allocation8 + $0xc0] sm:$0xff]  ;;  %v267_v43 = vld [vmem:[#allocation8 + $0xb8] sm:$0xff]  ;;  %v266_v44 = vld [vmem:[#allocation8 + $0xb0] sm:$0xff] }
  0x30   :  { %419 = vmatpush3.msra.mxu0 %v94_v5  ;;  %290 = vmatprep.subr.mxu1 %v273_v37  ;;  %v265_v45 = vld [vmem:[#allocation8 + $0xa8] sm:$0xff]  ;;  %v264_v46 = vld [vmem:[#allocation8 + $0xa0] sm:$0xff]  ;;  %v263_v47 = vld [vmem:[#allocation8 + $0x98] sm:$0xff] }
  0x31   :  { %420 = vmatprep.subr.mxu0 %v93_v6  ;;  %291 = vmatpush1.msra.mxu1 %v272_v38  ;;  %v262_v48 = vld [vmem:[#allocation8 + $0x90] sm:$0xff]  ;;  %v261_v49 = vld [vmem:[#allocation8 + $0x88] sm:$0xff]  ;;  %v260_v50 = vld [vmem:[#allocation8 + $0x80] sm:$0xff] }
  0x32   :  { %421 = vmatpush3.msra.mxu0 %v93_v6  ;;  %292 = vmatprep.subr.mxu1 %v271_v39  ;;  %v259_v51 = vld [vmem:[#allocation8 + $0x78] sm:$0xff]  ;;  %v258_v53 = vld [vmem:[#allocation8 + $0x70] sm:$0xff]  ;;  %v257_v54 = vld [vmem:[#allocation8 + $0x68] sm:$0xff] }
  0x33   :  { %422 = vmatprep.subr.mxu0 %v92_v7  ;;  %293 = vmatpush1.msra.mxu1 %v270_v40  ;;  %v256_v55 = vld [vmem:[#allocation8 + $0x60] sm:$0xff]  ;;  %v255_v56 = vld [vmem:[#allocation8 + $0x58] sm:$0xff]  ;;  %v254_v57 = vld [vmem:[#allocation8 + $0x50] sm:$0xff] }
  0x34   :  { %423 = vmatpush3.msra.mxu0 %v92_v7  ;;  %294 = vmatprep.subr.mxu1 %v269_v41  ;;  %v253_v58 = vld [vmem:[#allocation8 + $0x48] sm:$0xff]  ;;  %v252_v59 = vld [vmem:[#allocation8 + $0x40] sm:$0xff]  ;;  %v251_v60 = vld [vmem:[#allocation8 + $0x38] sm:$0xff] }
  0x35   :  { %424 = vmatprep.subr.mxu0 %v91_v8  ;;  %295 = vmatpush1.msra.mxu1 %v268_v42  ;;  %v250_v61 = vld [vmem:[#allocation8 + $0x30] sm:$0xff]  ;;  %v249_v62 = vld [vmem:[#allocation8 + $0x28] sm:$0xff]  ;;  %v248_v63 = vld [vmem:[#allocation8 + $0x20] sm:$0xff] }
  0x36   :  { %425 = vmatpush3.msra.mxu0 %v91_v8  ;;  %296 = vmatprep.subr.mxu1 %v267_v43  ;;  %v247_v0 = vld [vmem:[#allocation8 + $0x18] sm:$0xff]  ;;  %v246_v1 = vld [vmem:[#allocation8 + $0x10] sm:$0xff]  ;;  %v245_v2 = vld [vmem:[#allocation8 + $0x8] sm:$0xff] }
  0x37   :  { %426 = vmatprep.subr.mxu0 %v90_v9  ;;  %297 = vmatpush1.msra.mxu1 %v266_v44  ;;  %v244_v3 = vld [vmem:[#allocation8] sm:$0xff]  ;;  %v276_v35 = vld [vmem:[%s647_s6] sm:$0x3] }
  0x38   :  { %427 = vmatpush3.msra.mxu0 %v90_v9  ;;  %298 = vmatprep.subr.mxu1 %v265_v45 }
  0x39   :  { %428 = vmatprep.subr.mxu0 %v89_v10  ;;  %299 = vmatpush1.msra.mxu1 %v264_v46 }
  0x3a   :  { %429 = vmatpush3.msra.mxu0 %v89_v10  ;;  %300 = vmatprep.subr.mxu1 %v263_v47 }
  0x3b   :  { %430 = vmatprep.subr.mxu0 %v88_v11  ;;  %301 = vmatpush1.msra.mxu1 %v262_v48 }
  0x3c   :  { %431 = vmatpush3.msra.mxu0 %v88_v11  ;;  %302 = vmatprep.subr.mxu1 %v261_v49 }
  0x3d   :  { %432 = vmatprep.subr.mxu0 %v87_v12  ;;  %303 = vmatpush1.msra.mxu1 %v260_v50 }
  0x3e   :  { %433 = vmatpush3.msra.mxu0 %v87_v12  ;;  %304 = vmatprep.subr.mxu1 %v259_v51 }
  0x3f   :  { %434 = vmatprep.subr.mxu0 %v86_v13  ;;  %305 = vmatpush1.msra.mxu1 %v258_v53 }
  0x40   :  { %435 = vmatpush3.msra.mxu0 %v86_v13  ;;  %306 = vmatprep.subr.mxu1 %v257_v54 }
  0x41   :  { %436 = vmatprep.subr.mxu0 %v85_v14  ;;  %307 = vmatpush1.msra.mxu1 %v256_v55 }
  0x42   :  { %437 = vmatpush3.msra.mxu0 %v85_v14  ;;  %308 = vmatprep.subr.mxu1 %v255_v56 }
  0x43   :  { %438 = vmatprep.subr.mxu0 %v84_v15  ;;  %309 = vmatpush1.msra.mxu1 %v254_v57 }
  0x44   :  { %439 = vmatpush3.msra.mxu0 %v84_v15  ;;  %310 = vmatprep.subr.mxu1 %v253_v58 }
  0x45   :  { %440 = vmatprep.subr.mxu0 %v83_v16  ;;  %311 = vmatpush1.msra.mxu1 %v252_v59 }
  0x46   :  { %441 = vmatpush3.msra.mxu0 %v83_v16  ;;  %312 = vmatprep.subr.mxu1 %v251_v60 }
  0x47   :  { %443 = vmatmul.mubr.f32.vlgmr.msra.gmra.mxu0 %v82_v17  ;;  %313 = vmatpush1.msra.mxu1 %v250_v61 }
  0x48   :  { %314 = vmatprep.subr.mxu1 %v249_v62 }
  0x49   :  { %315 = vmatpush1.msra.mxu1 %v248_v63 }
  0x4a   :  { %316 = vmatprep.subr.mxu1 %v247_v0 }
  0x4b   :  { %317 = vmatpush1.msra.mxu1 %v246_v1 }
  0x4c   :  { %318 = vmatprep.subr.mxu1 %v245_v2 }
  0x4d   :  { %319 = vmatpush1.msra.mxu1 %v244_v3 }
 0x107   :  { %v444_v19 = vpop.f32.mrf.mxu0 }
 0x108   :  { %v178_v20 = vadd.f32 %v444_v19, %v389_v18 }
 0x109   :  { %v172_v21 = vpop.f32.mrf.mxu0 }
 0x10a   :  { %v184_v22 = vmul.f32 0.70710677, %v178_v20  ;;  %v173_v23 = vadd.f32 %v389_v18, %v172_v21  ;;  %v182_v26 = vmul.f32 0.5, %v178_v20 }
 0x10c   :  { %454 = verf.f32 %v184_v22  ;;  %v183_v24 = vmul.f32 0.70710677, %v173_v23  ;;  %v181_v29 = vmul.f32 0.5, %v173_v23 }
 0x10e   :  { %456 = verf.f32 %v183_v24 }
 0x119   :  { %v455_v25 = vpop.eup %454 }
 0x11a   :  { %v188_v27 = vadd.f32 1.0, %v455_v25 }
 0x11b   :  { %v457_v28 = vpop.eup %456 }
 0x11c   :  { %v612_v30 = vmul.f32 %v188_v27, %v182_v26  ;;  %v187_v31 = vadd.f32 1.0, %v457_v28  ;;  %v390_v26 = vld [vmem:[%s644_s3] ss:$0 sm:$0xff]  ;;  %s556_s3 = smov [#allocation9]  }
 0x11d   :  { %v391_v28 = vld [vmem:[%s645_s4] ss:$0 sm:$0xff]  ;;  %s374_s4 = sshll.u32 %s556_s3, 4  ;;  %s375_s4 = int_to_ptr.vmem [resolvable:$true] %s374_s4 }
 0x11e   :  { %193 = vadd.xlane.f32.xlu1 %v612_v30  ;;  %v615_v32 = vmul.f32 %v187_v31, %v181_v29  ;;  %v199_v33 = vmul.f32 %v612_v30, %v612_v30  ;;  %s522_s24 = scalar_lea.vmem %s375_s4, 512  ;;  %p527_p2 = scmp.lt.s32.totalorder %s375_s4, %s375_s4 }
 0x11f   :  { %p523_p1 = scmp.ne.s32.totalorder %s375_s4, %s522_s24  ;;  %p528_p3 = scmp.lt.s32.totalorder %s522_s24, %s522_s24 }
 0x120   :  { %191 = vadd.xlane.f32.xlu0 %v615_v32  ;;  %v198_v34 = vmul.f32 %v615_v32, %v615_v32 }
 0x121   :  { %p529_p4 = por %p528_p3, %p527_p2 }
 0x122   :  { %202 = vadd.xlane.f32.xlu1 %v199_v33 }
 0x123   :  { %p530_p5 = pnand %p529_p4, %p523_p1 }
 0x124   :  { %200 = vadd.xlane.f32.xlu0 %v198_v34 }
 0x1a7   :  { %v194_v4 = vpop.xlane.xlu1 %193 }
 0x1a8   :  { %v197_v5 = vmul.f32 0.0078125, %v194_v4 }
 0x1a9   :  { %v192_v6 = vpop.xlane.xlu0 %191 }
 0x1aa   :  { %v196_v7 = vmul.f32 0.0078125, %v192_v6  ;;  %v207_v9 = vmul.f32 %v197_v5, %v197_v5  ;;  %v213_v21 = vsub.f32 %v612_v30, %v197_v5 }
 0x1ab   :  { %v203_v8 = vpop.xlane.xlu1 %202 }
 0x1ac   :  { %v205_v10 = vmul.f32 0.0078125, %v203_v8  ;;  %v206_v12 = vmul.f32 %v196_v7, %v196_v7  ;;  %v212_v22 = vsub.f32 %v615_v32, %v196_v7  ;;  %v278_v32 = vlaneseq }
 0x1ad   :  { %v201_v11 = vpop.xlane.xlu0 %200 }
 0x1ae   :  { %v209_v13 = vsub.f32 %v205_v10, %v207_v9  ;;  %v204_v14 = vmul.f32 0.0078125, %v201_v11  ;;  %v279_v33 = vshrl.u32 %v278_v32, 7 }
 0x1b0   :  { %v211_v15 = vmax.f32 %v209_v13, 0.0  ;;  %v208_v16 = vsub.f32 %v204_v14, %v206_v12  ;;  %v280_v34 = vsub.s32 0, %v279_v33  ;;  %v284_v36 = vsub.s32 1, %v279_v33 }
 0x1b2   :  { %v215_v17 = vadd.f32 1e-05, %v211_v15  ;;  %v210_v18 = vmax.f32 %v208_v16, 0.0  ;;  %v281_v37 = vrot.slane %v276_v35, %v280_v34  ;;  %v285_v38 = vrot.slane %v276_v35, %v284_v36 }
 0x1b4   :  { %458 = vrsqrt.f32 %v215_v17  ;;  %v214_v19 = vadd.f32 1e-05, %v210_v18 }
 0x1b6   :  { %460 = vrsqrt.f32 %v214_v19 }
 0x1c1   :  { %v459_v20 = vpop.eup %458 }
 0x1c2   :  { %v219_v25 = vmul.f32 %v459_v20, %v213_v21 }
 0x1c3   :  { %v461_v23 = vpop.eup %460 }
 0x1c4   :  { %v218_v24 = vmul.f32 %v461_v23, %v212_v22  ;;  %v228_v31 = vmul.f32 %v390_v26, %v219_v25 }
 0x1c6   :  { %v227_v27 = vmul.f32 %v390_v26, %v218_v24  ;;  %v237_v30 = vadd.f32 %v391_v28, %v228_v31 }
 0x1c8   :  { %v236_v29 = vadd.f32 %v391_v28, %v227_v27 }
 0x1ca   :  { %353 = vmatmul.mubr.f32.vlgmr.msra.gmra.mxu1 %v236_v29 }
 0x1cb   :  { %358 = vmatprep.mubr.f32.mxu1 %v555_v52 }
 0x1ce   :  { %359 = vmatmul.mubr.f32.gmra.mxu1 %v237_v30 }
 0x28a   :  { %v354_v39 = vpop.f32.mrf.mxu1 }
 0x28b   :  { %v355_v40 = vadd.f32 %v354_v39, %v281_v37 }
 0x28c   :  { %v356_v41 = vpop.f32.mrf.mxu1 }
 0x28d   :  { %365 = vst [vmem:[#allocation9] sm:$0xff] %v355_v40  ;;  %v357_v42 = vadd.f32 %v356_v41, %v285_v38 }
 0x28e   :  { %v360_v43 = vpop.f32.mrf.mxu1 }
 0x28f   :  { %366 = vst [vmem:[#allocation9 + $0x8] sm:$0xff] %v357_v42  ;;  %v361_v44 = vadd.f32 %v360_v43, %v281_v37 }
 0x290   :  { %v362_v45 = vpop.f32.mrf.mxu1 }
 0x291   :  { %367 = vst [vmem:[#allocation9 + $0x10] sm:$0xff] %v361_v44  ;;  %v363_v46 = vadd.f32 %v362_v45, %v285_v38 }
 0x293   :  { %368 = vst [vmem:[#allocation9 + $0x18] sm:$0xff] %v363_v46 }
 0x294   :  { %533 = shalt.err (!%p530_p5)
}
 0x295   :  { %380 = dma.vmem_to_hbm [thread:$0]  %s375_s4, 512, %s648_s7, [#allocation5], %s553_s1, %s553_s1, %s554_s16  }
 0x296   :  { %546 = dma.done.wait [#allocation5], 512  }
 0x297   :  { %547 = vsyncadd [#allocation5], 4294966784 }
 0x298   :  { %384 = vsyncpa [#allocation4], 1 }
 0x299   :  { %385 = vsyncpa [#allocation7], 1 }
 0x29a   :  { %386 = vsyncpa [#allocation5], 1 }

</bundles_post_ra>
